<compile_context>
chip_gen: v7x
topology: tpu7x:2x2x1
jax: 0.10.0
libtpu: 0.0.40
codegen_flags: <defaults>
</compile_context>

<pallas_src>
import math

import jax
import jax.numpy as jnp
from jax.experimental import pallas as pl
from jax.experimental.pallas import tpu as pltpu


def _round_up(n, m):
    return ((n + m - 1) // m) * m


def _pos_emb_kernel(x_ref, p_ref, o_ref):
    # x_ref: [tb, 1] (I/O dtype); p_ref: [3, out_dim] f32; o_ref: [tb, out_dim]
    x = x_ref[...].astype(jnp.float32)
    scale = p_ref[0:1, :]            # [1 | 2*pi*w | 2*pi*w]
    phase = p_ref[1:2, :]            # [0 | 0..0   | pi/2..pi/2]
    mask = p_ref[2:3, :]             # [1 | 0..0   | 0..0]
    t = x * scale                    # [tb, out_dim]; t[:, 0] == x
    s = jnp.sin(t + phase)           # sin half and cos half with ONE sin
    out = jnp.where(mask > 0.0, t, s)
    o_ref[...] = out.astype(o_ref.dtype)


def random_or_learned_sinusoidal_pos_emb(x, weights, *, tile_b=2048):
    """x: [B] float. weights: [half_dim] float. Returns [B, 2*half_dim + 1]."""
    B = x.shape[0]
    half_dim = weights.shape[0]
    out_dim = 2 * half_dim + 1
    dtype = x.dtype
    itemsize = jnp.dtype(dtype).itemsize

    # Packed f32 parameter block [3, out_dim]: scale / additive phase / identity mask.
    w32 = weights.astype(jnp.float32) * (2.0 * math.pi)
    scale = jnp.concatenate([jnp.ones((1,), jnp.float32), w32, w32])
    phase = jnp.concatenate(
        [jnp.zeros((half_dim + 1,), jnp.float32),
         jnp.full((half_dim,), 0.5 * math.pi, jnp.float32)])
    mask = jnp.concatenate(
        [jnp.ones((1,), jnp.float32), jnp.zeros((2 * half_dim,), jnp.float32)])
    params = jnp.stack([scale, phase, mask], axis=0)  # [3, out_dim]

    # Sublane packing depends on dtype: 8 rows (f32), 16 (bf16/f16), 32 (8-bit).
    sublane = max(8, 32 // max(int(itemsize), 1))

    # Tile size: big tiles amortize the ~0.35us per-grid-step overhead, but stay
    # under v5e's 16 MiB default scoped VMEM limit. VMEM footprint accounting
    # uses the lane-padded width (out_dim rounds up to a 128-lane block) and a
    # rough 4x factor for double-buffered output + f32 intermediates.
    lane_pad = _round_up(out_dim, 128)
    vmem_budget = 12 * 1024 * 1024
    max_tb = max(sublane, (vmem_budget // (4 * lane_pad * 4)) // sublane * sublane)
    tb = min(tile_b, max_tb, _round_up(B, sublane))
    tb = max(sublane, (tb // sublane) * sublane)

    b_pad = _round_up(B, tb)
    x2 = x.reshape(B, 1)
    if b_pad != B:
        x2 = jnp.pad(x2, ((0, b_pad - B), (0, 0)))

    grid = (b_pad // tb,)

    cost = pl.CostEstimate(
        flops=4 * b_pad * out_dim,                 # mul + add + select (+cast)
        transcendentals=b_pad * out_dim,           # single sin over the tile
        bytes_accessed=(itemsize * b_pad           # x
                        + 4 * 3 * out_dim          # packed params (f32)
                        + itemsize * b_pad * out_dim),  # output
    )

    out = pl.pallas_call(
        _pos_emb_kernel,
        out_shape=jax.ShapeDtypeStruct((b_pad, out_dim), dtype),
        grid_spec=pltpu.PrefetchScalarGridSpec(
            num_scalar_prefetch=0,
            grid=grid,
            in_specs=[
                pl.BlockSpec((tb, 1), lambda i: (i, 0)),         # x tile
                pl.BlockSpec((3, out_dim), lambda i: (0, 0)),    # packed params
            ],
            out_specs=pl.BlockSpec((tb, out_dim), lambda i: (i, 0)),
        ),
        compiler_params=pltpu.CompilerParams(
            dimension_semantics=("parallel",),       # v7x: shard batch tiles over TCs
        ),
        cost_estimate=cost,
    )(x2, params)

    return out[:B] if b_pad != B else out


def _reference(x, weights):
    x2 = x.astype(jnp.float32)[:, None]
    w = weights.astype(jnp.float32)
    freqs = x2 * w[None, :] * 2.0 * math.pi
    fouriered = jnp.concatenate([jnp.sin(freqs), jnp.cos(freqs)], axis=-1)
    return jnp.concatenate([x2, fouriered], axis=-1)


if __name__ == "__main__":
    key = jax.random.PRNGKey(0)
    kx, kw, kx2 = jax.random.split(key, 3)

    # dim must be even; half_dim = dim // 2.
    B, dim = 8, 16
    half_dim = dim // 2
    x = jax.random.uniform(kx, (B,), jnp.float32, 0.0, 1.0)     # diffusion timesteps
    weights = jax.random.normal(kw, (half_dim,), jnp.float32)   # torch.randn(half_dim)

    out = jax.block_until_ready(random_or_learned_sinusoidal_pos_emb(x, weights))
    ref = _reference(x, weights)
    assert out.shape == (B, dim + 1), out.shape
    assert jnp.allclose(out, ref, atol=1e-4, rtol=1e-4), "mismatch vs reference (f32)"

    # Ragged batch (exercises wrapper padding / slicing path).
    B2 = 13
    x_r = jax.random.uniform(kx2, (B2,), jnp.float32, 0.0, 1.0)
    out_r = jax.block_until_ready(random_or_learned_sinusoidal_pos_emb(x_r, weights))
    ref_r = _reference(x_r, weights)
    assert out_r.shape == (B2, dim + 1), out_r.shape
    assert jnp.allclose(out_r, ref_r, atol=1e-4, rtol=1e-4), "mismatch vs reference (ragged)"

    print("KERNEL_OK")
</pallas_src>

<mosaic_0001>
module attributes {stable_mosaic.version = 11 : i64} {
  func.func @_pos_emb_kernel(%arg0: i32, %arg1: memref<8x1xf32, #tpu.memory_space<vmem>>, %arg2: memref<3x17xf32, #tpu.memory_space<vmem>>, %arg3: memref<8x17xf32, #tpu.memory_space<vmem>>) attributes {dimension_semantics = [#tpu.dimension_semantics<parallel>], iteration_bounds = array<i64: 1>, scalar_prefetch = 0 : i64, scratch_operands = 0 : i64, tpu.core_type = #tpu.core_type<tc>, window_params = [{transform_indices = @transform_0, window_bounds = array<i64: 8, 1>}, {pipeline_mode = #tpu.pipeline_mode<synchronous>, transform_indices = @transform_1, window_bounds = array<i64: 3, 17>}, {transform_indices = @transform_2, window_bounds = array<i64: 8, 17>}]} {
    %c0 = arith.constant 0 : index
    %c0_0 = arith.constant 0 : index
    %0 = vector.load %arg1[%c0, %c0_0] : memref<8x1xf32, #tpu.memory_space<vmem>>, vector<8x1xf32>
    %c0_1 = arith.constant 0 : index
    %c0_2 = arith.constant 0 : index
    %1 = vector.load %arg2[%c0_1, %c0_2] : memref<3x17xf32, #tpu.memory_space<vmem>>, vector<1x17xf32>
    %c1 = arith.constant 1 : index
    %c0_3 = arith.constant 0 : index
    %2 = vector.load %arg2[%c1, %c0_3] : memref<3x17xf32, #tpu.memory_space<vmem>>, vector<1x17xf32>
    %c2 = arith.constant 2 : index
    %c0_4 = arith.constant 0 : index
    %3 = vector.load %arg2[%c2, %c0_4] : memref<3x17xf32, #tpu.memory_space<vmem>>, vector<1x17xf32>
    %4 = vector.broadcast %0 : vector<8x1xf32> to vector<8x17xf32>
    %5 = vector.broadcast %1 : vector<1x17xf32> to vector<8x17xf32>
    %6 = arith.mulf %4, %5 : vector<8x17xf32>
    %7 = vector.broadcast %2 : vector<1x17xf32> to vector<8x17xf32>
    %8 = arith.addf %6, %7 : vector<8x17xf32>
    %9 = math.sin %8 : vector<8x17xf32>
    %cst = arith.constant 0.000000e+00 : f32
    %10 = vector.broadcast %cst : f32 to vector<1x17xf32>
    %11 = arith.cmpf ogt, %3, %10 : vector<1x17xf32>
    %12 = vector.shape_cast %11 : vector<1x17xi1> to vector<1x17xi1>
    %13 = vector.broadcast %12 : vector<1x17xi1> to vector<8x17xi1>
    %14 = arith.select %13, %6, %9 : vector<8x17xi1>, vector<8x17xf32>
    %c0_5 = arith.constant 0 : index
    %c0_6 = arith.constant 0 : index
    %15 = vector.load %arg3[%c0_5, %c0_6] : memref<8x17xf32, #tpu.memory_space<vmem>>, vector<8x17xf32>
    tpu.vector_store %arg3[%c0_5, %c0_6], %14 {strides = array<i32>} : memref<8x17xf32, #tpu.memory_space<vmem>>, vector<8x17xf32>,
    return
  }
  func.func @transform_0(%arg0: i32) -> (i32, i32) {
    %c0_i32 = arith.constant 0 : i32
    %c0_i32_0 = arith.constant 0 : i32
    return %arg0, %c0_i32 : i32, i32
  }
  func.func @transform_1(%arg0: i32) -> (i32, i32) {
    %c0_i32 = arith.constant 0 : i32
    %c0_i32_0 = arith.constant 0 : i32
    %c0_i32_1 = arith.constant 0 : i32
    return %c0_i32, %c0_i32_0 : i32, i32
  }
  func.func @transform_2(%arg0: i32) -> (i32, i32) {
    %c0_i32 = arith.constant 0 : i32
    %c0_i32_0 = arith.constant 0 : i32
    return %arg0, %c0_i32 : i32, i32
  }
}

</mosaic_0001>

<bundles_post_ra>
// kernel: tpu_custom_call.1
= control target key start
LH: loop header
LB: loop body
LE: loop exit
PB: predicated region body
PF: predicated region fallthrough
CT: control target
= control target key end

     0   :  { %v206_v1 = vmov 0   ;;  %s280_s0 = inlined_call_operand.vmem [shape: f32[8,1], index: 0, kind: input, shape index: {}]   ;;  %s281_s1 = inlined_call_operand.vmem [shape: f32[3,17], index: 1, kind: input, shape index: {}]   ;;  %s282_s2 = inlined_call_operand.hbm [shape: f32[8,17], index: 2, kind: output, shape index: {}]  }
   0x1   :  { %v12_v0 = vld [vmem:[%s280_s0] sm:$0xff]  ;;  %177 = vset.pattern.permute.xlu0 %v206_v1 }
   0x2   :  { %18 = vperm.xlu0 %177, %v12_v0  }
   0x3   :  { %7 = vsyncpa [#allocation3], 0  ;;  %v159_v2 = vld [vmem:[%s281_s1] ss:$0 sm:$0xff]  ;;  %v160_v3 = vld [vmem:[%s281_s1 + $0x1] ss:$0 sm:$0xff] }
   0x4   :  { %v207_v17 = vmov 683565275   ;;  %v208_v19 = vmov 2475754826   ;;  %v209_v22 = vmov 2131351028  }
   0x5   :  { %v210_v25 = vmov 2102212464   ;;  %v211_v28 = vmov 920167782   ;;  %v212_v31 = vmov 1326507024  }
   0x6   :  { %s213_s16 = smov [#allocation2]   ;;  %vm143_vm15 = vcmask 138240  }
   0x7   :  { %s151_s17 = sshll.u32 %s213_s16, 4  ;;  %s152_s17 = int_to_ptr.vmem [resolvable:$true] %s151_s17 }
   0x8   :  { %p187_p1 = scmp.lt.s32.totalorder %s152_s17, %s152_s17 }
  0x81   :  { %v19_v4 = vpop.permute.xlu0 %18 }
  0x82   :  { %v239_v5 = vmul.f32 %v159_v2, %v19_v4 }
  0x84   :  { %v242_v6 = vadd.f32 %v160_v3, %v239_v5 }
  0x86   :  { %v34_v7 = vand.u32 2139095040, %v242_v6  ;;  %v31_v11 = vand.u32 2147483647, %v242_v6  ;;  %vm33_vm7 = vcmp.lt.s32.totalorder %v242_v6, 0  ;;  %vm123_vm14 = vweird.f32 %v242_v6 }
  0x88   :  { %v35_v8 = vshrl.u32 %v34_v7, 23  ;;  %v38_v14 = vand.u32 8388607, %v31_v11  ;;  %vm32_vm8 = vcmp.le.f32.partialorder %v31_v11, 0.7853982 }
  0x8a   :  { %v161_v9 = vadd.s32 4294967169, %v35_v8  ;;  %v39_v33 = vor.u32 8388608, %v38_v14 }
  0x8c   :  { %v41_v10 = vadd.s32 1, %v161_v9  ;;  %v79_v47 = vshll.u32 %v39_v33, 8 }
  0x8e   :  { %vm42_vm0 = vcmp.gt.s32.totalorder %v41_v10, 0 }
  0x8f   :  { %v43_v12 = vsel %vm42_vm0, %v41_v10, 0 }
  0x90   :  { %v45_v13 = vand.u32 31, %v43_v12  ;;  %v44_v16 = vshrl.u32 %v43_v12, 5 }
  0x92   :  { %v46_v15 = vsub.s32 32, %v45_v13  ;;  %v48_v18 = vshll.u32 %v207_v17, %v45_v13  ;;  %v51_v20 = vshll.u32 %v208_v19, %v45_v13  ;;  %v54_v24 = vshll.u32 %v209_v22, %v45_v13 }
  0x93   :  { %v57_v27 = vshll.u32 %v210_v25, %v45_v13  ;;  %v60_v30 = vshll.u32 %v211_v28, %v45_v13  ;;  %vm63_vm1 = vcmp.lt.s32.totalorder %v44_v16, 1  ;;  %vm66_vm2 = vcmp.lt.s32.totalorder %v44_v16, 4 }
  0x94   :  { %v49_v21 = vshrl.u32 %v208_v19, %v46_v15  ;;  %v52_v23 = vshrl.u32 %v209_v22, %v46_v15  ;;  %v55_v26 = vshrl.u32 %v210_v25, %v46_v15  ;;  %v58_v29 = vshrl.u32 %v211_v28, %v46_v15  ;;  %v15_v28 = vld [vmem:[%s281_s1 + $0x2] sm:$0x1]  ;;  %s182_s1 = scalar_lea.vmem %s152_s17, 128 }
  0x95   :  { %v61_v32 = vshrl.u32 %v212_v31, %v46_v15  ;;  %v47_v42 = vshrl.u32 %v207_v17, %v46_v15  ;;  %vm65_vm3 = vcmp.lt.s32.totalorder %v44_v16, 3  ;;  %vm64_vm4 = vcmp.lt.s32.totalorder %v44_v16, 2  ;;  %p183_p0 = scmp.ne.s32.totalorder %s152_s17, %s182_s1  ;;  %p188_p2 = scmp.lt.s32.totalorder %s182_s1, %s182_s1 }
  0x96   :  { %v50_v34 = vor.u32 %v49_v21, %v48_v18  ;;  %v53_v35 = vor.u32 %v52_v23, %v51_v20  ;;  %v56_v36 = vor.u32 %v55_v26, %v54_v24  ;;  %v59_v37 = vor.u32 %v58_v29, %v57_v27 }
  0x97   :  { %v62_v38 = vor.u32 %v61_v32, %v60_v30  ;;  %v137_v24 = vlaneseq  ;;  %vm135_vm9 = vcmp.gt.f32.partialorder %v15_v28, 0.0  ;;  %p189_p3 = por %p188_p2, %p187_p1 }
  0x98   :  { %v68_v39 = vsel %vm66_vm2, %v56_v36, 2102212464  ;;  %v71_v40 = vsel %vm63_vm1, %v50_v34, %v53_v35  ;;  %v75_v41 = vsel %vm63_vm1, %v53_v35, %v56_v36  ;;  %v72_v43 = vsel %vm66_vm2, %v59_v37, 920167782 }
  0x99   :  { %v76_v44 = vsel %vm66_vm2, %v62_v38, 1326507024  ;;  %v73_v45 = vsel %vm65_vm3, %v56_v36, %v72_v43  ;;  %v67_v48 = vsel %vm63_vm1, %v47_v42, %v50_v34  ;;  %v69_v49 = vsel %vm65_vm3, %v53_v35, %v68_v39  ;;  %p190_p4 = pnand %p189_p3, %p183_p0 }
  0x9a   :  { %v77_v46 = vsel %vm65_vm3, %v59_v37, %v76_v44  ;;  %v74_v50 = vsel %vm64_vm4, %v71_v40, %v73_v45  ;;  %v70_v56 = vsel %vm64_vm4, %v67_v48, %v69_v49  ;;  %v138_v30 = vshrl.u32 %v137_v24, 7 }
  0x9b   :  { %v78_v51 = vsel %vm64_vm4, %v75_v41, %v77_v46  ;;  %v251_v54 = vmul.u32.u64.low %v79_v47, %v74_v50  ;;  %v252_v55 = vmul.u32.u64.high %v79_v47, %v74_v50, %v251_v54  ;;  %v86_v58 = vmul.u32 %v79_v47, %v70_v56 }
  0x9c   :  { %v248_v52 = vmul.u32.u64.low %v79_v47, %v78_v51  ;;  %v249_v53 = vmul.u32.u64.high %v79_v47, %v78_v51, %v248_v52  ;;  %v139_v32 = vsub.s32 0, %v138_v30  ;;  %v136_v33 = vsel %vm135_vm9, 1, %v206_v1 }
  0x9d   :  { %v89_v57 = vadd.s32 1, %v252_v55 }
  0x9e   :  { %vm88_vm5 = vc.u32 %v249_v53, %v251_v54  ;;  %v87_v9 = vadd.s32 %v251_v54, %v249_v53  ;;  %v140_v36 = vrot.slane %v136_v33, %v139_v32 }
  0x9f   :  { %v90_v59 = vsel %vm88_vm5, %v89_v57, %v252_v55 }
  0xa0   :  { %v91_v60 = vadd.s32 %v90_v59, %v86_v58  ;;  %vm141_vm12 = vcmp.eq.s32.totalorder %v140_v36, 1 }
  0xa2   :  { %v92_v61 = vadd.s32 536870912, %v91_v60 }
  0xa4   :  { %v93_v62 = vshrl.u32 %v92_v61, 30 }
  0xa6   :  { %v94_v63 = vshll.u32 %v93_v62, 30  ;;  %v117_v22 = vsub.s32 4, %v93_v62 }
  0xa8   :  { %v95_v0 = vsub.s32 %v91_v60, %v94_v63  ;;  %v118_v26 = vsel %vm33_vm7, %v117_v22, %v93_v62 }
  0xa9   :  { %v120_v29 = vsel %vm32_vm8, 0, %v118_v26 }
  0xaa   :  { %v97_v2 = vsub.s32 0, %v95_v0  ;;  %v124_v31 = vadd.s32 3, %v120_v29 }
  0xac   :  { %v162_v3 = vmin.u32 %v97_v2, %v95_v0  ;;  %v125_v34 = vand.u32 3, %v124_v31 }
  0xae   :  { %v99_v4 = vclz %v162_v3  ;;  %vm130_vm10 = vcmp.eq.s32.totalorder %v125_v34, 2  ;;  %vm127_vm11 = vcmp.eq.s32.totalorder %v125_v34, 0  ;;  %vm126_vm13 = vcmp.lt.s32.totalorder %v125_v34, 2 }
  0xb0   :  { %v163_v7 = vadd.s32 4294967294, %v99_v4 }
  0xb2   :  { %vm164_vm6 = vcmp.lt.s32.totalorder %v163_v7, 0 }
  0xb3   :  { %v102_v8 = vsel %vm164_vm6, 0, %v163_v7 }
  0xb4   :  { %v103_v10 = vsub.s32 32, %v102_v8  ;;  %v107_v12 = vsub.s32 4294967266, %v102_v8  ;;  %v104_v13 = vshll.u32 %v95_v0, %v102_v8 }
  0xb6   :  { %v105_v14 = vshrl.u32 %v87_v9, %v103_v10  ;;  %v108_v15 = vadd.s32 127, %v107_v12 }
  0xb8   :  { %v106_v16 = vor.u32 %v105_v14, %v104_v13  ;;  %v109_v17 = vshll.u32 %v108_v15, 23 }
  0xba   :  { %v110_v18 = vor.u32 4788187, %v109_v17  ;;  %v113_v20 = vcvt.s32.f32 %v106_v16 }
  0xbc   :  { %v111_v19 = vand.u32 2147483647, %v110_v18 }
  0xbe   :  { %v114_v21 = vmul.f32 %v113_v20, %v111_v19 }
  0xc0   :  { %v115_v23 = vxor.u32 2147483648, %v114_v21 }
  0xc2   :  { %v116_v25 = vsel %vm33_vm7, %v115_v23, %v114_v21 }
  0xc3   :  { %v119_v27 = vsel %vm32_vm8, %v242_v6, %v116_v25 }
  0xc4   :  { %178 = vcosq.f32 %v119_v27 }
  0xc5   :  { %180 = vsinq.f32 %v119_v27 }
  0xce   :  { %v179_v35 = vpop.eup %178 }
  0xcf   :  { %v181_v11 = vpop.eup %180  ;;  %v131_v37 = vxor.u32 2147483648, %v179_v35 }
  0xd0   :  { %v128_v38 = vxor.u32 2147483648, %v181_v11 }
  0xd1   :  { %v132_v39 = vsel %vm130_vm10, %v131_v37, %v181_v11 }
  0xd2   :  { %v129_v40 = vsel %vm127_vm11, %v179_v35, %v128_v38 }
  0xd3   :  { %v133_v41 = vsel %vm126_vm13, %v129_v40, %v132_v39 }
  0xd4   :  { %v134_v42 = vsel %vm123_vm14, nan, %v133_v41 }
  0xd5   :  { %v142_v1 = vsel %vm141_vm12, %v239_v5, %v134_v42 }
  0xd6   :  { %144 = vst.msk [vmem:[#allocation2] sm:$0xff] %vm143_vm15, %v142_v1 }
  0xd7   :  { %193 = shalt.err (!%p190_p4)
}
  0xd8   :  { %s194_s20 = scalar_lea.hbm %s282_s2, 128 }
  0xd9   :  { %p195_p5 = scmp.ne.s32.totalorder %s282_s2, %s194_s20  ;;  %p198_p6 = scmp.lt.u32.totalorder %s194_s20, %s282_s2 }
  0xdb   :  { %p200_p7 = pnand %p198_p6, %p195_p5 }
  0xdd   :  { %203 = shalt.err (!%p200_p7)
}
  0xde   :  { %154 = dma.vmem_to_hbm [thread:$0]  %s152_s17, 128, %s282_s2, [#allocation3]  }
  0xdf   :  { %204 = dma.done.wait [#allocation3], 128  }
  0xe0   :  { %205 = vsyncadd [#allocation3], 4294967168 }
  0xe1   :  { %158 = vsyncpa [#allocation3], 1 }

</bundles_post_ra>
